<compile_context>
chip_gen: v6e
topology: v6e:2x2x1
jax: 0.10.0
libtpu: 0.0.40
codegen_flags: <defaults>
</compile_context>

<pallas_src>
from functools import partial

import jax
import jax.numpy as jnp
from jax.experimental import pallas as pl
from jax.experimental.pallas import tpu as pltpu


def _identity_copy_kernel(x_ref, o_ref):
    # Pure pass-through of the current VMEM tile.
    o_ref[...] = x_ref[...]


def _chip_tuning():
    """Static (host-side) per-generation block size / scoped-VMEM choice."""
    try:
        kind = jax.devices()[0].device_kind.lower()
    except Exception:  # pragma: no cover - no device visible at trace time
        kind = ""
    conservative = any(tag in kind for tag in ("v2", "v3", "v4", "v5"))
    if conservative:
        # v5e: 16 MiB default scoped VMEM -> 2 MiB blocks (4 resident = 8 MiB),
        # explicit limit so we are not at the mercy of the default.
        return 2 * 1024 * 1024, 14 * 1024 * 1024
    # v6e / v7x: 32 MiB default scoped VMEM -> 4 MiB blocks (16 MiB resident).
    return 4 * 1024 * 1024, None


def _pick_lane_cols(size: int):
    """Largest lane-dense (multiple of 128) column count dividing `size`."""
    for cols in (8192, 4096, 2048, 1024, 512, 384, 256, 128):
        if size % cols == 0:
            return cols
    return None


@partial(jax.jit, donate_argnums=(0,))
def _identity_copy(x: jax.Array) -> jax.Array:
    """Lane-dense tiled VMEM copy implementing the identity on TPU."""
    orig_shape = x.shape
    size = int(x.size)
    itemsize = jnp.dtype(x.dtype).itemsize
    sub = {1: 32, 2: 16, 4: 8}.get(itemsize, 8)  # dtype-aware sublane multiple

    block_bytes, vmem_limit = _chip_tuning()
    cp_kwargs = dict(dimension_semantics=("parallel",))
    if vmem_limit is not None:
        cp_kwargs["vmem_limit_bytes"] = vmem_limit
    compiler_params = pltpu.CompilerParams(**cp_kwargs)
    cost = pl.CostEstimate(
        flops=0, transcendentals=0, bytes_accessed=2 * size * itemsize
    )

    cols = _pick_lane_cols(size)
    if cols is not None:
        # 2-D lane-dense path: (rows, cols) with cols a multiple of 128.
        rows = size // cols
        x2d = x.reshape(rows, cols)
        target_rows = max(sub, (block_bytes // (cols * itemsize)) // sub * sub)
        tile_rows = rows if rows <= target_rows else target_rows
        grid = (pl.cdiv(rows, tile_rows),)  # ragged final block masked by Pallas
        out = pl.pallas_call(
            _identity_copy_kernel,
            out_shape=jax.ShapeDtypeStruct((rows, cols), x.dtype),
            grid_spec=pltpu.PrefetchScalarGridSpec(
                num_scalar_prefetch=0,
                grid=grid,
                in_specs=[pl.BlockSpec((tile_rows, cols), lambda i: (i, 0))],
                out_specs=pl.BlockSpec((tile_rows, cols), lambda i: (i, 0)),
            ),
            compiler_params=compiler_params,
            cost_estimate=cost,
            input_output_aliases={0: 0},
        )(x2d)
        return out.reshape(orig_shape)

    # Ragged fallback: flatten to 1-D; all blocks are full-width lane-dense
    # except the final (masked) ragged one. No padding / extra HBM traffic.
    x1d = x.reshape(size)
    target_elems = max(128, (block_bytes // itemsize) // 1024 * 1024)
    if size <= target_elems:
        tile = size  # single full-extent block (always a legal block shape)
    else:
        tile = target_elems
    grid = (pl.cdiv(size, tile),)
    out = pl.pallas_call(
        _identity_copy_kernel,
        out_shape=jax.ShapeDtypeStruct((size,), x.dtype),
        grid_spec=pltpu.PrefetchScalarGridSpec(
            num_scalar_prefetch=0,
            grid=grid,
            in_specs=[pl.BlockSpec((tile,), lambda i: (i,))],
            out_specs=pl.BlockSpec((tile,), lambda i: (i,)),
        ),
        compiler_params=compiler_params,
        cost_estimate=cost,
        input_output_aliases={0: 0},
    )(x1d)
    return out.reshape(orig_shape)


def prior_guided_ffn(x: jax.Array, *, exercise_kernel: bool = False) -> jax.Array:
    """PriorGuidedFFN.forward — identity.

    Production path: return x (no kernel launch, no HBM round trip).
    `exercise_kernel=True` runs the Pallas lane-dense copy kernel instead.
    """
    if not exercise_kernel:
        return x
    if x.ndim == 0 or x.size == 0:
        return x
    return _identity_copy(x)


if __name__ == "__main__":
    key = jax.random.PRNGKey(0)
    # NCHW input, consistent with how this FFN module is used in a conv net.
    shape = (2, 4, 16, 16)
    x = jax.random.normal(key, shape, dtype=jnp.float32)

    # Production fast path: identity with no kernel launch.
    y_fast = prior_guided_ffn(x)
    assert y_fast.shape == shape and y_fast.dtype == jnp.float32

    # Kernel path: lane-dense tiled VMEM copy (donates x into the call).
    y = prior_guided_ffn(x, exercise_kernel=True)
    jax.block_until_ready(y)

    # `x` was donated/aliased into the kernel path, so regenerate the
    # deterministic reference for the correctness check.
    x_ref = jax.random.normal(key, shape, dtype=jnp.float32)
    assert y.shape == shape and y.dtype == jnp.float32
    assert bool(jnp.allclose(y, x_ref)), "identity forward mismatch"

    # Non-128-divisible size: exercises the 1-D ragged fallback path (bf16
    # also exercises the dtype-aware sublane rounding).
    x2 = jax.random.normal(jax.random.PRNGKey(0), (3, 5, 7), dtype=jnp.bfloat16)
    y2 = prior_guided_ffn(x2, exercise_kernel=True)
    jax.block_until_ready(y2)
    x2_ref = jax.random.normal(jax.random.PRNGKey(0), (3, 5, 7), dtype=jnp.bfloat16)
    assert y2.shape == (3, 5, 7) and y2.dtype == jnp.bfloat16
    assert bool(jnp.array_equal(y2, x2_ref)), "ragged identity forward mismatch"

    print("KERNEL_OK")
</pallas_src>

<mosaic_0001>
module attributes {stable_mosaic.version = 11 : i64} {
  func.func @_identity_copy_kernel(%arg0: i32, %arg1: memref<1x2048xf32, #tpu.memory_space<vmem>>, %arg2: memref<1x2048xf32, #tpu.memory_space<vmem>>) attributes {dimension_semantics = [#tpu.dimension_semantics<parallel>], iteration_bounds = array<i64: 1>, scalar_prefetch = 0 : i64, scratch_operands = 0 : i64, tpu.core_type = #tpu.core_type<tc>, window_params = [{transform_indices = @transform_0, window_bounds = array<i64: 1, 2048>}, {transform_indices = @transform_1, window_bounds = array<i64: 1, 2048>}]} {
    %c0 = arith.constant 0 : index
    %c0_0 = arith.constant 0 : index
    %0 = vector.load %arg1[%c0, %c0_0] : memref<1x2048xf32, #tpu.memory_space<vmem>>, vector<1x2048xf32>
    %c0_1 = arith.constant 0 : index
    %c0_2 = arith.constant 0 : index
    %1 = vector.load %arg2[%c0_1, %c0_2] : memref<1x2048xf32, #tpu.memory_space<vmem>>, vector<1x2048xf32>
    tpu.vector_store %arg2[%c0_1, %c0_2], %0 {strides = array<i32>} : memref<1x2048xf32, #tpu.memory_space<vmem>>, vector<1x2048xf32>,
    return
  }
  func.func @transform_0(%arg0: i32) -> (i32, i32) {
    %c0_i32 = arith.constant 0 : i32
    %c0_i32_0 = arith.constant 0 : i32
    return %arg0, %c0_i32 : i32, i32
  }
  func.func @transform_1(%arg0: i32) -> (i32, i32) {
    %c0_i32 = arith.constant 0 : i32
    %c0_i32_0 = arith.constant 0 : i32
    return %arg0, %c0_i32 : i32, i32
  }
}

</mosaic_0001>

<bundles_post_ra>
// kernel: _identity_copy.1
= control target key start
LH: loop header
LB: loop body
LE: loop exit
PB: predicated region body
PF: predicated region fallthrough
CT: control target
= control target key end

     0   :  { %s38_s0 = inlined_call_operand.vmem [shape: f32[1,2048], index: 0, kind: input, shape index: {}, may-alias: {0,1}]   ;;  %s39_s1 = inlined_call_operand.vmem [shape: f32[1,2048], index: 1, kind: output, shape index: {}, may-alias: {0,1}]  }
   0x1   :  { %v8_v0 = vld [vmem:[%s38_s0] sm:$0xff]  ;;  %v9_v1 = vld [vmem:[%s38_s0 + $0x8] sm:$0xff] }
   0x2   :  { %10 = vst [vmem:[%s39_s1] sm:$0xff] %v8_v0  ;;  %11 = vst [vmem:[%s39_s1 + $0x8] sm:$0xff] %v9_v1 }

</bundles_post_ra>
